<compile_context>
chip_gen: v5e
topology: v5e:2x2
jax: 0.10.0
libtpu: 0.0.40
codegen_flags: <defaults>
</compile_context>

<pallas_src>
import functools

import numpy as np
import jax
import jax.numpy as jnp
from jax import lax
from jax.experimental import pallas as pl
from jax.experimental.pallas import tpu as pltpu


def _routing_table(max_depth):
    """Static tree structure in heap numbering (root 0, children 2i+1 / 2i+2).

    Returns python lists anc[level][leaf] = node visited at `level` on the path to `leaf`,
    bits[level][leaf] = 1 if that step goes right, else 0.  Leaf index == path bitmask
    (MSB-first, 1 = R)."""
    num_leaves = 2 ** max_depth
    anc = [[0] * num_leaves for _ in range(max_depth)]
    bits = [[0] * num_leaves for _ in range(max_depth)]
    for leaf in range(num_leaves):
        node = 0
        for level in range(max_depth):
            bit = (leaf >> (max_depth - 1 - level)) & 1
            anc[level][leaf] = node
            bits[level][leaf] = bit
            node = 2 * node + 2 if bit else 2 * node + 1
    return anc, bits


def _ddt_kernel(x_ref, w_ref, b_ref, leavesT_ref, out_ref, path_ref, *,
                max_depth, anc, bits, num_leaves):
    f32 = jnp.float32

    x = x_ref[...].astype(f32)                 # (TB, F)  batch tile (batch -> lanes below)
    w = w_ref[...].astype(f32)                 # (N, F)   all internal-node weights
    b = b_ref[...].astype(f32)                 # (N, 1)
    leaves_t = leavesT_ref[...].astype(f32)    # (num_output, num_leaves)

    # Node logits for the whole tile, batch on the lane axis: (N, TB).
    # HIGHEST precision only here: the >= 0.5 routing threshold must match an f32 reference.
    logits = lax.dot_general(w, x, (((1,), (1,)), ((), ())),
                             precision=lax.Precision.HIGHEST,
                             preferred_element_type=f32) + b
    vals = jax.nn.sigmoid(logits)              # (N, TB)
    go_r = vals >= 0.5                         # hard routing decision per node
    v_right = jnp.where(go_r, vals, 0.0)       # val     where routed right, exact 0 otherwise
    v_left = jnp.where(go_r, 0.0, 1.0 - vals)  # 1 - val where routed left,  exact 0 otherwise

    tb = x.shape[0]
    num_output = leaves_t.shape[0]

    # Per-leaf gate via static row slices (tree structure is a trace-time constant).
    # For the routed leaf the product of per-level terms equals `gate`; for every other leaf
    # some term is exactly 0, so leaf selection + gating collapse into VPU multiply-adds —
    # no MXU selector matmuls, no gathers.
    out = jnp.zeros((num_output, tb), f32)
    path = jnp.zeros((1, tb), jnp.int32)
    for leaf in range(num_leaves):
        g = None
        for level in range(max_depth):
            node = anc[level][leaf]
            src = v_right if bits[level][leaf] else v_left
            term = src[node:node + 1, :]                     # (1, TB) static row slice
            g = term if g is None else g * term
        # out[o, b] += prob_dist[leaf, o] * gate_leaf(b)  (exact 0 unless routed here)
        out = out + leaves_t[:, leaf:leaf + 1] * g           # (num_output,1)*(1,TB) broadcast
        if leaf:
            path = path + leaf * (g > 0.0).astype(jnp.int32)

    out_ref[...] = out.astype(out_ref.dtype)                 # (num_output, TB) lane-dense
    path_ref[...] = path                                     # (1, TB) int32 path bitmask


def _choose_block_b(batch, max_block=1024):
    """Biggest 128-multiple tile up to max_block, keeping >= 2 grid steps when possible so
    v7x's two TensorCores both get work (single-TC v5e/v6e just see fewer, larger steps)."""
    b128 = -(-batch // 128) * 128
    blk = min(max_block, b128)
    if b128 >= 256:
        blk = min(blk, max(128, (b128 // 2) // 128 * 128))
    return blk


@functools.partial(jax.jit, static_argnames=("max_depth", "block_b"))
def _ddt_forward_impl(x, W, b, leaves, max_depth, block_b):
    B, F = x.shape
    num_nodes = W.shape[0]
    num_leaves, num_output = leaves.shape
    assert num_nodes == 2 ** max_depth - 1 and num_leaves == 2 ** max_depth
    assert max_depth <= 30, "path bitmask packs one bit per level into an int32"

    pad = (-B) % block_b
    xp = jnp.pad(x, ((0, pad), (0, 0))) if pad else x
    bp = B + pad

    leaves_t = jnp.asarray(leaves, jnp.float32).T            # (num_output, num_leaves)
    anc, bits = _routing_table(max_depth)                    # trace-time constants

    kernel = functools.partial(_ddt_kernel, max_depth=max_depth, anc=anc, bits=bits,
                               num_leaves=num_leaves)

    out_t, path_t = pl.pallas_call(
        kernel,
        out_shape=(
            jax.ShapeDtypeStruct((num_output, bp), jnp.float32),
            jax.ShapeDtypeStruct((1, bp), jnp.int32),
        ),
        grid=(bp // block_b,),
        in_specs=[
            pl.BlockSpec((block_b, F), lambda i: (i, 0)),              # x tile
            pl.BlockSpec((num_nodes, F), lambda i: (0, 0)),            # W (resident)
            pl.BlockSpec((num_nodes, 1), lambda i: (0, 0)),            # b (resident)
            pl.BlockSpec((num_output, num_leaves), lambda i: (0, 0)),  # leaves^T (resident)
        ],
        out_specs=(
            pl.BlockSpec((num_output, block_b), lambda i: (0, i)),     # lane-dense stores
            pl.BlockSpec((1, block_b), lambda i: (0, i)),
        ),
        compiler_params=pltpu.CompilerParams(dimension_semantics=("parallel",)),
    )(xp, jnp.asarray(W, jnp.float32), jnp.asarray(b, jnp.float32), leaves_t)

    # Slice + transpose inside the same jit so XLA fuses it with the kernel outputs.
    return out_t[:, :B].T, path_t[0, :B]


def ddt_forward(x, W, b, leaves, max_depth, *, block_b=None):
    """Batched DDT forward.
      x: (B, F), W: (num_nodes, F), b: (num_nodes, 1), leaves: (num_leaves, num_output).
    Returns (out (B, num_output) f32, path (B,) int32 bitmask, MSB-first, 1 = R)."""
    if block_b is None:
        block_b = _choose_block_b(x.shape[0])
    return _ddt_forward_impl(x, W, b, leaves, max_depth=max_depth, block_b=block_b)


def decode_path(bits, max_depth):
    return ''.join('R' if (int(bits) >> (max_depth - 1 - d)) & 1 else 'L'
                   for d in range(max_depth))


def ddt_reference_np(x, W, b, leaves, max_depth):
    """Vectorized numpy (float64) reference mirroring the recursive PyTorch forward.
    Note: samples with a node value extremely close to 0.5 could route differently than the
    in-kernel f32 computation; not observed at these seeds/shapes."""
    x = np.asarray(x, np.float64)
    W = np.asarray(W, np.float64)
    b = np.asarray(b, np.float64)
    leaves = np.asarray(leaves, np.float64)
    B = x.shape[0]
    num_nodes = W.shape[0]
    logits = x @ W.T + b[:, 0][None, :]
    vals = 1.0 / (1.0 + np.exp(-logits))                     # (B, num_nodes)
    idx = np.zeros(B, np.int64)
    gate = np.ones(B, np.float64)
    path = np.zeros(B, np.int64)
    for _ in range(max_depth):
        v = vals[np.arange(B), idx]
        right = v >= 0.5
        gate *= np.where(right, v, 1.0 - v)
        idx = np.where(right, 2 * idx + 2, 2 * idx + 1)
        path = path * 2 + right.astype(np.int64)
    out = gate[:, None] * leaves[idx - num_nodes]
    return out, path


if __name__ == "__main__":
    num_input = 32
    num_output = 8
    max_depth = 3
    num_nodes = 2 ** max_depth - 1
    num_leaves = 2 ** max_depth

    key = jax.random.PRNGKey(0)
    k_x, k_w, k_b, k_l = jax.random.split(key, 4)

    # Parameters matching the module's shapes (weights ~ N(0, 0.1); bias / prob_dist are
    # trainable, so use small random values to exercise the full routing + leaf paths).
    W = 0.1 * jax.random.normal(k_w, (num_nodes, num_input), dtype=jnp.float32)
    b = 0.05 * jax.random.normal(k_b, (num_nodes, 1), dtype=jnp.float32)
    leaves = jax.random.uniform(k_l, (num_leaves, num_output), dtype=jnp.float32,
                                minval=0.1, maxval=1.0)

    # batch=200 exercises padding + a 2-step 128-row grid; batch=1000 exercises the larger
    # auto-chosen tile (512 rows, 2 grid steps).
    for batch in (200, 1000):
        kx = jax.random.fold_in(k_x, batch)
        x = jax.random.normal(kx, (batch, num_input), dtype=jnp.float32)

        out, path = ddt_forward(x, W, b, leaves, max_depth)
        out = jax.block_until_ready(out)
        path = jax.block_until_ready(path)

        ref_out, ref_path = ddt_reference_np(x, W, b, leaves, max_depth)

        assert np.array_equal(np.asarray(path), ref_path), "routing path mismatch"
        assert np.allclose(np.asarray(out), ref_out, atol=1e-5, rtol=1e-4), "output mismatch"
        assert decode_path(path[0], max_depth) == decode_path(ref_path[0], max_depth)

    print("KERNEL_OK")
</pallas_src>

<mosaic_0001>
module attributes {stable_mosaic.version = 11 : i64} {
  func.func @_ddt_kernel(%arg0: i32, %arg1: memref<128x32xf32, #tpu.memory_space<vmem>>, %arg2: memref<7x32xf32, #tpu.memory_space<vmem>>, %arg3: memref<7x1xf32, #tpu.memory_space<vmem>>, %arg4: memref<8x8xf32, #tpu.memory_space<vmem>>, %arg5: memref<8x128xf32, #tpu.memory_space<vmem>>, %arg6: memref<1x128xi32, #tpu.memory_space<vmem>>) attributes {dimension_semantics = [#tpu.dimension_semantics<parallel>], iteration_bounds = array<i64: 2>, scalar_prefetch = 0 : i64, scratch_operands = 0 : i64, tpu.core_type = #tpu.core_type<tc>, window_params = [{transform_indices = @transform_0, window_bounds = array<i64: 128, 32>}, {pipeline_mode = #tpu.pipeline_mode<synchronous>, transform_indices = @transform_1, window_bounds = array<i64: 7, 32>}, {pipeline_mode = #tpu.pipeline_mode<synchronous>, transform_indices = @transform_2, window_bounds = array<i64: 7, 1>}, {pipeline_mode = #tpu.pipeline_mode<synchronous>, transform_indices = @transform_3, window_bounds = array<i64: 8, 8>}, {transform_indices = @transform_4, window_bounds = array<i64: 8, 128>}, {transform_indices = @transform_5, window_bounds = array<i64: 1, 128>}]} {
    %c0 = arith.constant 0 : index
    %c0_0 = arith.constant 0 : index
    %0 = vector.load %arg1[%c0, %c0_0] : memref<128x32xf32, #tpu.memory_space<vmem>>, vector<128x32xf32>
    %c0_1 = arith.constant 0 : index
    %c0_2 = arith.constant 0 : index
    %1 = vector.load %arg2[%c0_1, %c0_2] : memref<7x32xf32, #tpu.memory_space<vmem>>, vector<7x32xf32>
    %c0_3 = arith.constant 0 : index
    %c0_4 = arith.constant 0 : index
    %2 = vector.load %arg3[%c0_3, %c0_4] : memref<7x1xf32, #tpu.memory_space<vmem>>, vector<7x1xf32>
    %c0_5 = arith.constant 0 : index
    %c0_6 = arith.constant 0 : index
    %3 = vector.load %arg4[%c0_5, %c0_6] : memref<8x8xf32, #tpu.memory_space<vmem>>, vector<8x8xf32>
    %cst = arith.constant dense<0.000000e+00> : vector<7x128xf32>
    %4 = tpu.matmul %1, %0, %cst {dimension_numbers = #tpu.dot_dimension_numbers<[1], [1], [0], [0], [0, 0, 1, 0], [], []>, precision = #tpu.contract_precision<fp32>} : vector<7x32xf32>, vector<128x32xf32>, vector<7x128xf32> -> vector<7x128xf32>
    %5 = vector.broadcast %2 : vector<7x1xf32> to vector<7x128xf32>
    %6 = arith.addf %4, %5 : vector<7x128xf32>
    %7 = arith.negf %6 : vector<7x128xf32>
    %8 = math.exp %7 : vector<7x128xf32>
    %cst_7 = arith.constant 1.000000e+00 : f32
    %9 = vector.broadcast %cst_7 : f32 to vector<7x128xf32>
    %10 = arith.addf %9, %8 : vector<7x128xf32>
    %11 = arith.divf %9, %10 : vector<7x128xf32>
    %cst_8 = arith.constant 5.000000e-01 : f32
    %12 = vector.broadcast %cst_8 : f32 to vector<7x128xf32>
    %13 = arith.cmpf oge, %11, %12 : vector<7x128xf32>
    %cst_9 = arith.constant 0.000000e+00 : f32
    %14 = vector.broadcast %cst_9 : f32 to vector<7x128xf32>
    %15 = arith.select %13, %11, %14 : vector<7x128xi1>, vector<7x128xf32>
    %cst_10 = arith.constant 1.000000e+00 : f32
    %16 = vector.broadcast %cst_10 : f32 to vector<7x128xf32>
    %17 = arith.subf %16, %11 : vector<7x128xf32>
    %cst_11 = arith.constant 0.000000e+00 : f32
    %18 = vector.broadcast %cst_11 : f32 to vector<7x128xf32>
    %19 = arith.select %13, %18, %17 : vector<7x128xi1>, vector<7x128xf32>
    %cst_12 = arith.constant 0.000000e+00 : f32
    %20 = vector.broadcast %cst_12 : f32 to vector<8x128xf32>
    %c0_i32 = arith.constant 0 : i32
    %21 = vector.broadcast %c0_i32 : i32 to vector<1x128xi32>
    %22 = vector.extract_strided_slice %19 {offsets = [0, 0], sizes = [1, 128], strides = [1, 1]} : vector<7x128xf32> to vector<1x128xf32>
    %23 = vector.extract_strided_slice %19 {offsets = [1, 0], sizes = [1, 128], strides = [1, 1]} : vector<7x128xf32> to vector<1x128xf32>
    %24 = arith.mulf %22, %23 : vector<1x128xf32>
    %25 = vector.extract_strided_slice %19 {offsets = [3, 0], sizes = [1, 128], strides = [1, 1]} : vector<7x128xf32> to vector<1x128xf32>
    %26 = arith.mulf %24, %25 : vector<1x128xf32>
    %27 = vector.extract_strided_slice %3 {offsets = [0, 0], sizes = [8, 1], strides = [1, 1]} : vector<8x8xf32> to vector<8x1xf32>
    %28 = vector.broadcast %27 : vector<8x1xf32> to vector<8x128xf32>
    %29 = vector.broadcast %26 : vector<1x128xf32> to vector<8x128xf32>
    %30 = arith.mulf %28, %29 : vector<8x128xf32>
    %31 = arith.addf %20, %30 : vector<8x128xf32>
    %32 = vector.extract_strided_slice %19 {offsets = [0, 0], sizes = [1, 128], strides = [1, 1]} : vector<7x128xf32> to vector<1x128xf32>
    %33 = vector.extract_strided_slice %19 {offsets = [1, 0], sizes = [1, 128], strides = [1, 1]} : vector<7x128xf32> to vector<1x128xf32>
    %34 = arith.mulf %32, %33 : vector<1x128xf32>
    %35 = vector.extract_strided_slice %15 {offsets = [3, 0], sizes = [1, 128], strides = [1, 1]} : vector<7x128xf32> to vector<1x128xf32>
    %36 = arith.mulf %34, %35 : vector<1x128xf32>
    %37 = vector.extract_strided_slice %3 {offsets = [0, 1], sizes = [8, 1], strides = [1, 1]} : vector<8x8xf32> to vector<8x1xf32>
    %38 = vector.broadcast %37 : vector<8x1xf32> to vector<8x128xf32>
    %39 = vector.broadcast %36 : vector<1x128xf32> to vector<8x128xf32>
    %40 = arith.mulf %38, %39 : vector<8x128xf32>
    %41 = arith.addf %31, %40 : vector<8x128xf32>
    %cst_13 = arith.constant 0.000000e+00 : f32
    %42 = vector.broadcast %cst_13 : f32 to vector<1x128xf32>
    %43 = arith.cmpf ogt, %36, %42 : vector<1x128xf32>
    %44 = arith.extui %43 : vector<1x128xi1> to vector<1x128xi32>
    %c1_i32 = arith.constant 1 : i32
    %45 = vector.broadcast %c1_i32 : i32 to vector<1x128xi32>
    %46 = arith.muli %45, %44 : vector<1x128xi32>
    %47 = arith.addi %21, %46 : vector<1x128xi32>
    %48 = vector.extract_strided_slice %19 {offsets = [0, 0], sizes = [1, 128], strides = [1, 1]} : vector<7x128xf32> to vector<1x128xf32>
    %49 = vector.extract_strided_slice %15 {offsets = [1, 0], sizes = [1, 128], strides = [1, 1]} : vector<7x128xf32> to vector<1x128xf32>
    %50 = arith.mulf %48, %49 : vector<1x128xf32>
    %51 = vector.extract_strided_slice %19 {offsets = [4, 0], sizes = [1, 128], strides = [1, 1]} : vector<7x128xf32> to vector<1x128xf32>
    %52 = arith.mulf %50, %51 : vector<1x128xf32>
    %53 = vector.extract_strided_slice %3 {offsets = [0, 2], sizes = [8, 1], strides = [1, 1]} : vector<8x8xf32> to vector<8x1xf32>
    %54 = vector.broadcast %53 : vector<8x1xf32> to vector<8x128xf32>
    %55 = vector.broadcast %52 : vector<1x128xf32> to vector<8x128xf32>
    %56 = arith.mulf %54, %55 : vector<8x128xf32>
    %57 = arith.addf %41, %56 : vector<8x128xf32>
    %cst_14 = arith.constant 0.000000e+00 : f32
    %58 = vector.broadcast %cst_14 : f32 to vector<1x128xf32>
    %59 = arith.cmpf ogt, %52, %58 : vector<1x128xf32>
    %60 = arith.extui %59 : vector<1x128xi1> to vector<1x128xi32>
    %c2_i32 = arith.constant 2 : i32
    %61 = vector.broadcast %c2_i32 : i32 to vector<1x128xi32>
    %62 = arith.muli %61, %60 : vector<1x128xi32>
    %63 = arith.addi %47, %62 : vector<1x128xi32>
    %64 = vector.extract_strided_slice %19 {offsets = [0, 0], sizes = [1, 128], strides = [1, 1]} : vector<7x128xf32> to vector<1x128xf32>
    %65 = vector.extract_strided_slice %15 {offsets = [1, 0], sizes = [1, 128], strides = [1, 1]} : vector<7x128xf32> to vector<1x128xf32>
    %66 = arith.mulf %64, %65 : vector<1x128xf32>
    %67 = vector.extract_strided_slice %15 {offsets = [4, 0], sizes = [1, 128], strides = [1, 1]} : vector<7x128xf32> to vector<1x128xf32>
    %68 = arith.mulf %66, %67 : vector<1x128xf32>
    %69 = vector.extract_strided_slice %3 {offsets = [0, 3], sizes = [8, 1], strides = [1, 1]} : vector<8x8xf32> to vector<8x1xf32>
    %70 = vector.broadcast %69 : vector<8x1xf32> to vector<8x128xf32>
    %71 = vector.broadcast %68 : vector<1x128xf32> to vector<8x128xf32>
    %72 = arith.mulf %70, %71 : vector<8x128xf32>
    %73 = arith.addf %57, %72 : vector<8x128xf32>
    %cst_15 = arith.constant 0.000000e+00 : f32
    %74 = vector.broadcast %cst_15 : f32 to vector<1x128xf32>
    %75 = arith.cmpf ogt, %68, %74 : vector<1x128xf32>
    %76 = arith.extui %75 : vector<1x128xi1> to vector<1x128xi32>
    %c3_i32 = arith.constant 3 : i32
    %77 = vector.broadcast %c3_i32 : i32 to vector<1x128xi32>
    %78 = arith.muli %77, %76 : vector<1x128xi32>
    %79 = arith.addi %63, %78 : vector<1x128xi32>
    %80 = vector.extract_strided_slice %15 {offsets = [0, 0], sizes = [1, 128], strides = [1, 1]} : vector<7x128xf32> to vector<1x128xf32>
    %81 = vector.extract_strided_slice %19 {offsets = [2, 0], sizes = [1, 128], strides = [1, 1]} : vector<7x128xf32> to vector<1x128xf32>
    %82 = arith.mulf %80, %81 : vector<1x128xf32>
    %83 = vector.extract_strided_slice %19 {offsets = [5, 0], sizes = [1, 128], strides = [1, 1]} : vector<7x128xf32> to vector<1x128xf32>
    %84 = arith.mulf %82, %83 : vector<1x128xf32>
    %85 = vector.extract_strided_slice %3 {offsets = [0, 4], sizes = [8, 1], strides = [1, 1]} : vector<8x8xf32> to vector<8x1xf32>
    %86 = vector.broadcast %85 : vector<8x1xf32> to vector<8x128xf32>
    %87 = vector.broadcast %84 : vector<1x128xf32> to vector<8x128xf32>
    %88 = arith.mulf %86, %87 : vector<8x128xf32>
    %89 = arith.addf %73, %88 : vector<8x128xf32>
    %cst_16 = arith.constant 0.000000e+00 : f32
    %90 = vector.broadcast %cst_16 : f32 to vector<1x128xf32>
    %91 = arith.cmpf ogt, %84, %90 : vector<1x128xf32>
    %92 = arith.extui %91 : vector<1x128xi1> to vector<1x128xi32>
    %c4_i32 = arith.constant 4 : i32
    %93 = vector.broadcast %c4_i32 : i32 to vector<1x128xi32>
    %94 = arith.muli %93, %92 : vector<1x128xi32>
    %95 = arith.addi %79, %94 : vector<1x128xi32>
    %96 = vector.extract_strided_slice %15 {offsets = [0, 0], sizes = [1, 128], strides = [1, 1]} : vector<7x128xf32> to vector<1x128xf32>
    %97 = vector.extract_strided_slice %19 {offsets = [2, 0], sizes = [1, 128], strides = [1, 1]} : vector<7x128xf32> to vector<1x128xf32>
    %98 = arith.mulf %96, %97 : vector<1x128xf32>
    %99 = vector.extract_strided_slice %15 {offsets = [5, 0], sizes = [1, 128], strides = [1, 1]} : vector<7x128xf32> to vector<1x128xf32>
    %100 = arith.mulf %98, %99 : vector<1x128xf32>
    %101 = vector.extract_strided_slice %3 {offsets = [0, 5], sizes = [8, 1], strides = [1, 1]} : vector<8x8xf32> to vector<8x1xf32>
    %102 = vector.broadcast %101 : vector<8x1xf32> to vector<8x128xf32>
    %103 = vector.broadcast %100 : vector<1x128xf32> to vector<8x128xf32>
    %104 = arith.mulf %102, %103 : vector<8x128xf32>
    %105 = arith.addf %89, %104 : vector<8x128xf32>
    %cst_17 = arith.constant 0.000000e+00 : f32
    %106 = vector.broadcast %cst_17 : f32 to vector<1x128xf32>
    %107 = arith.cmpf ogt, %100, %106 : vector<1x128xf32>
    %108 = arith.extui %107 : vector<1x128xi1> to vector<1x128xi32>
    %c5_i32 = arith.constant 5 : i32
    %109 = vector.broadcast %c5_i32 : i32 to vector<1x128xi32>
    %110 = arith.muli %109, %108 : vector<1x128xi32>
    %111 = arith.addi %95, %110 : vector<1x128xi32>
    %112 = vector.extract_strided_slice %15 {offsets = [0, 0], sizes = [1, 128], strides = [1, 1]} : vector<7x128xf32> to vector<1x128xf32>
    %113 = vector.extract_strided_slice %15 {offsets = [2, 0], sizes = [1, 128], strides = [1, 1]} : vector<7x128xf32> to vector<1x128xf32>
    %114 = arith.mulf %112, %113 : vector<1x128xf32>
    %115 = vector.extract_strided_slice %19 {offsets = [6, 0], sizes = [1, 128], strides = [1, 1]} : vector<7x128xf32> to vector<1x128xf32>
    %116 = arith.mulf %114, %115 : vector<1x128xf32>
    %117 = vector.extract_strided_slice %3 {offsets = [0, 6], sizes = [8, 1], strides = [1, 1]} : vector<8x8xf32> to vector<8x1xf32>
    %118 = vector.broadcast %117 : vector<8x1xf32> to vector<8x128xf32>
    %119 = vector.broadcast %116 : vector<1x128xf32> to vector<8x128xf32>
    %120 = arith.mulf %118, %119 : vector<8x128xf32>
    %121 = arith.addf %105, %120 : vector<8x128xf32>
    %cst_18 = arith.constant 0.000000e+00 : f32
    %122 = vector.broadcast %cst_18 : f32 to vector<1x128xf32>
    %123 = arith.cmpf ogt, %116, %122 : vector<1x128xf32>
    %124 = arith.extui %123 : vector<1x128xi1> to vector<1x128xi32>
    %c6_i32 = arith.constant 6 : i32
    %125 = vector.broadcast %c6_i32 : i32 to vector<1x128xi32>
    %126 = arith.muli %125, %124 : vector<1x128xi32>
    %127 = arith.addi %111, %126 : vector<1x128xi32>
    %128 = vector.extract_strided_slice %15 {offsets = [0, 0], sizes = [1, 128], strides = [1, 1]} : vector<7x128xf32> to vector<1x128xf32>
    %129 = vector.extract_strided_slice %15 {offsets = [2, 0], sizes = [1, 128], strides = [1, 1]} : vector<7x128xf32> to vector<1x128xf32>
    %130 = arith.mulf %128, %129 : vector<1x128xf32>
    %131 = vector.extract_strided_slice %15 {offsets = [6, 0], sizes = [1, 128], strides = [1, 1]} : vector<7x128xf32> to vector<1x128xf32>
    %132 = arith.mulf %130, %131 : vector<1x128xf32>
    %133 = vector.extract_strided_slice %3 {offsets = [0, 7], sizes = [8, 1], strides = [1, 1]} : vector<8x8xf32> to vector<8x1xf32>
    %134 = vector.broadcast %133 : vector<8x1xf32> to vector<8x128xf32>
    %135 = vector.broadcast %132 : vector<1x128xf32> to vector<8x128xf32>
    %136 = arith.mulf %134, %135 : vector<8x128xf32>
    %137 = arith.addf %121, %136 : vector<8x128xf32>
    %cst_19 = arith.constant 0.000000e+00 : f32
    %138 = vector.broadcast %cst_19 : f32 to vector<1x128xf32>
    %139 = arith.cmpf ogt, %132, %138 : vector<1x128xf32>
    %140 = arith.extui %139 : vector<1x128xi1> to vector<1x128xi32>
    %c7_i32 = arith.constant 7 : i32
    %141 = vector.broadcast %c7_i32 : i32 to vector<1x128xi32>
    %142 = arith.muli %141, %140 : vector<1x128xi32>
    %143 = arith.addi %127, %142 : vector<1x128xi32>
    %c0_20 = arith.constant 0 : index
    %c0_21 = arith.constant 0 : index
    %144 = vector.load %arg5[%c0_20, %c0_21] : memref<8x128xf32, #tpu.memory_space<vmem>>, vector<8x128xf32>
    tpu.vector_store %arg5[%c0_20, %c0_21], %137 {strides = array<i32>} : memref<8x128xf32, #tpu.memory_space<vmem>>, vector<8x128xf32>,
    %c0_22 = arith.constant 0 : index
    %c0_23 = arith.constant 0 : index
    %145 = vector.load %arg6[%c0_22, %c0_23] : memref<1x128xi32, #tpu.memory_space<vmem>>, vector<1x128xi32>
    tpu.vector_store %arg6[%c0_22, %c0_23], %143 {strides = array<i32>} : memref<1x128xi32, #tpu.memory_space<vmem>>, vector<1x128xi32>,
    return
  }
  func.func @transform_0(%arg0: i32) -> (i32, i32) {
    %c0_i32 = arith.constant 0 : i32
    %c0_i32_0 = arith.constant 0 : i32
    return %arg0, %c0_i32 : i32, i32
  }
  func.func @transform_1(%arg0: i32) -> (i32, i32) {
    %c0_i32 = arith.constant 0 : i32
    %c0_i32_0 = arith.constant 0 : i32
    %c0_i32_1 = arith.constant 0 : i32
    return %c0_i32, %c0_i32_0 : i32, i32
  }
  func.func @transform_2(%arg0: i32) -> (i32, i32) {
    %c0_i32 = arith.constant 0 : i32
    %c0_i32_0 = arith.constant 0 : i32
    %c0_i32_1 = arith.constant 0 : i32
    return %c0_i32, %c0_i32_0 : i32, i32
  }
  func.func @transform_3(%arg0: i32) -> (i32, i32) {
    %c0_i32 = arith.constant 0 : i32
    %c0_i32_0 = arith.constant 0 : i32
    %c0_i32_1 = arith.constant 0 : i32
    return %c0_i32, %c0_i32_0 : i32, i32
  }
  func.func @transform_4(%arg0: i32) -> (i32, i32) {
    %c0_i32 = arith.constant 0 : i32
    %c0_i32_0 = arith.constant 0 : i32
    return %c0_i32, %arg0 : i32, i32
  }
  func.func @transform_5(%arg0: i32) -> (i32, i32) {
    %c0_i32 = arith.constant 0 : i32
    %c0_i32_0 = arith.constant 0 : i32
    return %c0_i32, %arg0 : i32, i32
  }
}

</mosaic_0001>

<bundles_post_ra>
// kernel: _ddt_forward_impl.1
= control target key start
LH: loop header
LB: loop body
LE: loop exit
PB: predicated region body
PF: predicated region fallthrough
CT: control target
= control target key end

     0   :  { %11 = vsyncpa [#allocation3], 0  ;;  %s1459_s0 = inlined_call_operand.vmem [shape: f32[256,32], index: 0, kind: input, shape index: {}]   ;;  %s1460_s1 = inlined_call_operand.vmem [shape: f32[7,32], index: 1, kind: input, shape index: {}]   ;;  %s1461_s2 = inlined_call_operand.vmem [shape: f32[7,1], index: 2, kind: input, shape index: {}]   ;;  %s1462_s3 = inlined_call_operand.vmem [shape: f32[8,8], index: 3, kind: input, shape index: {}]   ;;  %s1463_s4 = inlined_call_operand.vmem [shape: f32[8,256], index: 4, kind: output, shape index: {0}]   ;;  %s1464_s5 = inlined_call_operand.hbm [shape: s32[1,256], index: 5, kind: output, shape index: {1}]  }
   0x1   :  { %13 = vsyncpa [#allocation3 + $0x1], 0  ;;  %s1069_s18 = smov 0   ;;  %s1071_s19 = smov 0  }
   0x2   :  { %s1073_s20 = smov 0   ;;  %s1075_s21 = smov 0  }
   0x3 LB: > { %s1090_s22 = sadd.s32 4294967295, %s1029_s21   ;;  %s897_s23 = sadd.s32 4294967294, %s1029_s21   ;;  %s1029_s21 = sphi %s1075_s21, %s1470_s21   ;;  %s1025_s20 = sphi %s1073_s20, %s1469_s20   ;;  %s1021_s19 = sphi %s1071_s19, %s1468_s19   ;;  %s1017_s18 = sphi %s1069_s18, %s1467_s18  }
   0x4   : > { %s1094_s24 = sadd.s32 1, %s1029_s21   ;;  %s141_s25 = sadd.s32 1, %s1025_s20 }
   0x5   : > { %s138_s26 = ssub.s32 %s1029_s21, %s1094_s24  ;;  %p151_p0 = scmp.ne.s32.totalorder %s1025_s20, %s1021_s19 }
   0x6   : > { %p139_p1 = scmp.eq.s32.totalorder %s138_s26, 0  ;;  %p152_p2 = scmp.eq.s32.totalorder %s1090_s22, 1 }
   0x7   : > { %p157_p3 = scmp.ne.s32.totalorder %s1021_s19, %s1017_s18  ;;  %p158_p4 = scmp.eq.s32.totalorder %s897_s23, 1 }
   0x8   : > { %s1105_s27 = scalar_select %p139_p1, %s1025_s20, %s141_s25  }
   0x9   : > { %p1107_p5 = por %p152_p2, %p151_p0  ;;  %p1111_p6 = por %p158_p4, %p157_p3 }
   0xa   : > { %p900_p7 = scmp.ge.s32.totalorder %s1029_s21, 1  ;;  %p194_p8 = scmp.lt.s32.totalorder %s1029_s21, 3 }
   0xc   : > { %p195_p9 = pnand %p900_p7, %p194_p8 }
   0xd   : > { %s901_s30 = sshll.u32 (!%p195_p9), %s1090_s22, 4  ;;  %p231_p11 = scmp.lt.s32.totalorder (!%p195_p9), %s1090_s22, 1 }
   0xe   : > { %198 = sbr.rel (%p195_p9) target bundleno = 347 (0x15b), region = 36  ;;  %p226_p10 = scmp.lt.s32.totalorder (!%p195_p9), %s901_s30, 31 }
   0xf   : > { %s223_s17 = sand.u32 (!%p195_p9), 1, %s1021_s19   ;;  %s814_s26 = scalar_lea.hbm (!%p195_p9), %s1464_s5, %s1090_s22 }
  0x10   : > { %s818_s8 = sshll.u32 (!%p195_p9), %s814_s26, 4  ;;  %s819_s8 = int_to_ptr.hbm [resolvable:$true] %s818_s8 }
  0x11   : > { %s981_s12 = sshra.s32 (!%p195_p9), %s819_s8, 4  ;;  %s982_s12 = int_to_ptr.hbm [resolvable:$true] %s981_s12 }
  0x12   : > { %s983_s13 = scalar_lea.hbm (!%p195_p9), %s982_s12, 1  ;;  %p988_p1 = scmp.lt.s32.totalorder (!%p195_p9), %s982_s12, %s1464_s5 }
  0x13   : > { %s1472_s30 = smov (!%p226_p10, %s901_s30), 31  ;;  %vm259_vm0 = vcmask 261120   ;;  %p984_p12 = scmp.ne.s32.totalorder %s982_s12, %s983_s13 }
  0x14   : > { %s902_s6 = sshll.u32 %s1472_s30, 3 }
  0x15   : > { %s1121_s9 = scalar_lea.vmem %s1459_s0, %s902_s6  ;;  %s224_s6 = scalar_lea.vmem [#allocation2], %s223_s17 }
  0x16   : > { %v250_v0 = vld [vmem:[%s1121_s9 + $0x78] sm:$0xff]  ;;  %v249_v1 = vld [vmem:[%s1121_s9 + $0x70] sm:$0xff]  ;;  %v248_v2 = vld [vmem:[%s1121_s9 + $0x68] sm:$0xff]  ;;  %s1414_s16 = scalar_select %p231_p11, %s1090_s22, 1 }
  0x17   : > { %v309_v3 = vsel %vm259_vm0, %v250_v0, 0  ;;  %v306_v4 = vsel %vm259_vm0, %v249_v1, 0  ;;  %v303_v5 = vsel %vm259_vm0, %v248_v2, 0  ;;  %v247_v6 = vld [vmem:[%s1121_s9 + $0x60] sm:$0xff]  ;;  %v246_v7 = vld [vmem:[%s1121_s9 + $0x58] sm:$0xff]  ;;  %v245_v17 = vld [vmem:[%s1121_s9 + $0x50] sm:$0xff]  ;;  %p985_p13 = pnand %p984_p12, %p1107_p5 }
  0x18   : > { %v1131_v8 = vand.u32 4294901760, %v309_v3  ;;  %v1133_v9 = vand.u32 4294901760, %v306_v4  ;;  %v1135_v10 = vand.u32 4294901760, %v303_v5  ;;  %v300_v11 = vsel %vm259_vm0, %v247_v6, 0  ;;  %v244_v26 = vld [vmem:[%s1121_s9 + $0x48] sm:$0xff]  ;;  %v243_v34 = vld [vmem:[%s1121_s9 + $0x40] sm:$0xff] }
  0x19   : > { %v1138_v12 = vand.u32 4294901760, %v300_v11  ;;  %v297_v16 = vsel %vm259_vm0, %v246_v7, 0  ;;  %v294_v21 = vsel %vm259_vm0, %v245_v17, 0  ;;  %v291_v29 = vsel %vm259_vm0, %v244_v26, 0  ;;  %v242_v41 = vld [vmem:[%s1121_s9 + $0x38] sm:$0xff]  ;;  %v241_v48 = vld [vmem:[%s1121_s9 + $0x30] sm:$0xff]  ;;  %p986_p0 = pneg %p985_p13 }
  0x1a   : > { %312 = vmatpush.xpose.msra.mxu0 %v1131_v8  ;;  %v1142_v13 = vsub.f32 %v309_v3, %v1131_v8  ;;  %v1145_v14 = vsub.f32 %v306_v4, %v1133_v9  ;;  %v1148_v15 = vsub.f32 %v303_v5, %v1135_v10  ;;  %508 = vmatpush.xpose.msra.mxu3 %v1131_v8  ;;  %v1156_v20 = vand.u32 4294901760, %v297_v16  ;;  %v240_v55 = vld [vmem:[%s1121_s9 + $0x28] sm:$0xff]  ;;  %v239_v62 = vld [vmem:[%s1121_s9 + $0x20] sm:$0xff]  ;;  %v238_v5 = vld [vmem:[%s1121_s9 + $0x18] sm:$0xff]  ;;  %s903_s30 = sshll.u32 %s1414_s16, 3  ;;  %s816_s7 = sshll.u32 %s224_s6, 4  ;;  %s817_s7 = int_to_ptr.vmem [resolvable:$true] %s816_s7 }
  0x1b   : > { %v1168_v25 = vsub.f32 %v300_v11, %v1138_v12  ;;  %v1173_v28 = vand.u32 4294901760, %v294_v21  ;;  %v1187_v35 = vand.u32 4294901760, %v291_v29  ;;  %v288_v36 = vsel %vm259_vm0, %v243_v34, 0  ;;  %v236_v34 = vld [vmem:[%s1121_s9 + $0x8] sm:$0xff]  ;;  %s234_s11 = scalar_lea.vmem %s1463_s4, %s903_s30  ;;  %s803_s22 = scalar_lea.sflag [#allocation3], %s223_s17 }
  0x1c   : > { %v354_v18 = vand.u32 4294901760, %v1142_v13  ;;  %v360_v19 = vand.u32 4294901760, %v1145_v14  ;;  %455 = vmatpush.xpose.msra.mxu2 %v1142_v13  ;;  %v366_v24 = vand.u32 4294901760, %v1148_v15  ;;  %v1182_v33 = vsub.f32 %v297_v16, %v1156_v20  ;;  %s987_s16 = scalar_lea.hbm %s1464_s5, 2 }
  0x1d   : > { %v372_v32 = vand.u32 4294901760, %v1168_v25  ;;  %v1196_v40 = vsub.f32 %v294_v21, %v1173_v28  ;;  %v1202_v42 = vsub.f32 %v291_v29, %v1187_v35  ;;  %v1204_v43 = vand.u32 4294901760, %v288_v36  ;;  %p989_p2 = scmp.lt.s32.totalorder %s987_s16, %s983_s13 }
  0x1e   : > { %v355_v22 = vsub.f32 %v1142_v13, %v354_v18  ;;  %314 = vmatpush.xpose.msra.mxu0 %v1133_v9  ;;  %v361_v23 = vsub.f32 %v1145_v14, %v360_v19  ;;  %510 = vmatpush.xpose.msra.mxu3 %v1133_v9  ;;  %v367_v31 = vsub.f32 %v1148_v15, %v366_v24  ;;  %v378_v39 = vand.u32 4294901760, %v1182_v33  ;;  %v251_v13 = vld [vmem:[%s1460_s1] sm:$0x7f] }
  0x1f   : > { %v373_v38 = vsub.f32 %v1168_v25, %v372_v32  ;;  %v384_v46 = vand.u32 4294901760, %v1196_v40  ;;  %v285_v47 = vsel %vm259_vm0, %v242_v41, 0  ;;  %v390_v49 = vand.u32 4294901760, %v1202_v42  ;;  %p990_p3 = por %p989_p2, %p988_p1 }
  0x20   : > { %v356_v27 = vand.u32 4294901760, %v355_v22  ;;  %458 = vmatpush.xpose.msra.mxu2 %v1145_v14  ;;  %v362_v30 = vand.u32 4294901760, %v361_v23  ;;  %v368_v37 = vand.u32 4294901760, %v367_v31  ;;  %v379_v45 = vsub.f32 %v1182_v33, %v378_v39  ;;  %v237_v22 = vld [vmem:[%s1121_s9 + $0x10] sm:$0xff] }
  0x21   : > { %v374_v44 = vand.u32 4294901760, %v373_v38  ;;  %v1217_v50 = vsub.f32 %v288_v36, %v1204_v43  ;;  %v385_v52 = vsub.f32 %v1196_v40, %v384_v46  ;;  %v1223_v53 = vand.u32 4294901760, %v285_v47  ;;  %p991_p4 = pnand %p990_p3, %p986_p0 }
  0x22   : > { %357 = vmatpush.xpose.msra.mxu1 %v356_v27  ;;  %316 = vmatpush.xpose.msra.mxu0 %v1135_v10  ;;  %v380_v51 = vand.u32 4294901760, %v379_v45  ;;  %v282_v54 = vsel %vm259_vm0, %v241_v48, 0  ;;  %v391_v56 = vsub.f32 %v1202_v42, %v390_v49  ;;  %v279_v61 = vsel %vm259_vm0, %v240_v55, 0 }
  0x23   : > { %512 = vmatpush.xpose.msra.mxu3 %v1135_v10  ;;  %v396_v57 = vand.u32 4294901760, %v1217_v50  ;;  %v386_v58 = vand.u32 4294901760, %v385_v52  ;;  %v1235_v59 = vsub.f32 %v285_v47, %v1223_v53  ;;  %v1237_v60 = vand.u32 4294901760, %v282_v54  ;;  %v235_v47 = vld [vmem:[%s1121_s9] sm:$0xff] }
  0x24   : > { %461 = vmatpush.xpose.msra.mxu2 %v1148_v15  ;;  %v392_v63 = vand.u32 4294901760, %v391_v56  ;;  %v1251_v3 = vand.u32 4294901760, %v279_v61  ;;  %v276_v4 = vsel %vm259_vm0, %v239_v62, 0  ;;  %v273_v21 = vsel %vm259_vm0, %v238_v5, 0 }
  0x25   : > { %v397_v0 = vsub.f32 %v1217_v50, %v396_v57  ;;  %v402_v1 = vand.u32 4294901760, %v1235_v59  ;;  %v1249_v2 = vsub.f32 %v282_v54, %v1237_v60  ;;  %v1257_v6 = vand.u32 4294901760, %v276_v4 }
  0x26   : > { %363 = vmatpush.xpose.msra.mxu1 %v362_v30  ;;  %318 = vmatpush.xpose.msra.mxu0 %v1138_v12  ;;  %v1265_v17 = vsub.f32 %v279_v61, %v1251_v3  ;;  %v1279_v30 = vand.u32 4294901760, %v273_v21  ;;  %v270_v31 = vsel %vm259_vm0, %v237_v22, 0  ;;  %v267_v45 = vsel %vm259_vm0, %v236_v34, 0 }
  0x27   : > { %514 = vmatpush.xpose.msra.mxu3 %v1138_v12  ;;  %v398_v7 = vand.u32 4294901760, %v397_v0  ;;  %v403_v11 = vsub.f32 %v1235_v59, %v402_v1  ;;  %v408_v16 = vand.u32 4294901760, %v1249_v2  ;;  %v1272_v23 = vsub.f32 %v276_v4, %v1257_v6 }
  0x28   : > { %464 = vmatpush.xpose.msra.mxu2 %v1168_v25  ;;  %v414_v29 = vand.u32 4294901760, %v1265_v17  ;;  %v1291_v41 = vsub.f32 %v273_v21, %v1279_v30  ;;  %v1307_v55 = vand.u32 4294901760, %v267_v45  ;;  %v264_v56 = vsel %vm259_vm0, %v235_v47, 0 }
  0x29   : > { %v404_v26 = vand.u32 4294901760, %v403_v11  ;;  %v409_v27 = vsub.f32 %v1249_v2, %v408_v16  ;;  %v420_v36 = vand.u32 4294901760, %v1272_v23  ;;  %v1320_v0 = vand.u32 4294901760, %v264_v56 }
  0x2a   : > { %369 = vmatpush.xpose.msra.mxu1 %v368_v37  ;;  %320 = vmatpush.xpose.msra.mxu0 %v1156_v20  ;;  %v415_v38 = vsub.f32 %v1265_v17, %v414_v29  ;;  %v426_v52 = vand.u32 4294901760, %v1291_v41  ;;  %v261_v14 = vsel %vm259_vm0, %v251_v13, 0  ;;  %v1033_v25 = vmov 3  }
  0x2b   : > { %516 = vmatpush.xpose.msra.mxu3 %v1156_v20  ;;  %v410_v37 = vand.u32 4294901760, %v409_v27  ;;  %v421_v48 = vsub.f32 %v1272_v23, %v420_v36  ;;  %v1330_v11 = vsub.f32 %v264_v56, %v1320_v0  ;;  %957 = vset.pattern.permute.xlu2 %v1033_v25 }
  0x2c   : > { %467 = vmatpush.xpose.msra.mxu2 %v1182_v33  ;;  %v427_v61 = vsub.f32 %v1291_v41, %v426_v52  ;;  %v1036_v33 = vmov 4  }
  0x2e   : > { %375 = vmatpush.xpose.msra.mxu1 %v374_v44  ;;  %322 = vmatpush.xpose.msra.mxu0 %v1173_v28  ;;  %v1293_v44 = vand.u32 4294901760, %v270_v31  ;;  %v428_v4 = vand.u32 4294901760, %v427_v61 }
  0x2f   : > { %518 = vmatpush.xpose.msra.mxu3 %v1173_v28 }
  0x30   : > { %470 = vmatpush.xpose.msra.mxu2 %v1196_v40  ;;  %v1305_v54 = vsub.f32 %v270_v31, %v1293_v44 }
  0x32   : > { %381 = vmatpush.xpose.msra.mxu1 %v380_v51  ;;  %324 = vmatpush.xpose.msra.mxu0 %v1187_v35  ;;  %v416_v51 = vand.u32 4294901760, %v415_v38  ;;  %v432_v62 = vand.u32 4294901760, %v1305_v54 }
  0x33   : > { %520 = vmatpush.xpose.msra.mxu3 %v1187_v35 }
  0x34   : > { %473 = vmatpush.xpose.msra.mxu2 %v1202_v42  ;;  %v433_v5 = vsub.f32 %v1305_v54, %v432_v62 }
  0x36   : > { %387 = vmatpush.xpose.msra.mxu1 %v386_v58  ;;  %326 = vmatpush.xpose.msra.mxu0 %v1204_v43  ;;  %v422_v58 = vand.u32 4294901760, %v421_v48  ;;  %v434_v21 = vand.u32 4294901760, %v433_v5 }
  0x37   : > { %522 = vmatpush.xpose.msra.mxu3 %v1204_v43 }
  0x38   : > { %476 = vmatpush.xpose.msra.mxu2 %v1217_v50 }
  0x3a   : > { %393 = vmatpush.xpose.msra.mxu1 %v392_v63  ;;  %328 = vmatpush.xpose.msra.mxu0 %v1223_v53  ;;  %v1318_v63 = vsub.f32 %v267_v45, %v1307_v55 }
  0x3b   : > { %524 = vmatpush.xpose.msra.mxu3 %v1223_v53 }
  0x3c   : > { %479 = vmatpush.xpose.msra.mxu2 %v1235_v59 }
  0x3e   : > { %399 = vmatpush.xpose.msra.mxu1 %v398_v7  ;;  %330 = vmatpush.xpose.msra.mxu0 %v1237_v60  ;;  %v438_v7 = vand.u32 4294901760, %v1318_v63 }
  0x3f   : > { %526 = vmatpush.xpose.msra.mxu3 %v1237_v60 }
  0x40   : > { %482 = vmatpush.xpose.msra.mxu2 %v1249_v2  ;;  %v439_v22 = vsub.f32 %v1318_v63, %v438_v7 }
  0x42   : > { %405 = vmatpush.xpose.msra.mxu1 %v404_v26  ;;  %332 = vmatpush.xpose.msra.mxu0 %v1251_v3  ;;  %v444_v26 = vand.u32 4294901760, %v1330_v11  ;;  %v440_v27 = vand.u32 4294901760, %v439_v22 }
  0x43   : > { %528 = vmatpush.xpose.msra.mxu3 %v1251_v3 }
  0x44   : > { %485 = vmatpush.xpose.msra.mxu2 %v1265_v17  ;;  %v445_v31 = vsub.f32 %v1330_v11, %v444_v26 }
  0x46   : > { %411 = vmatpush.xpose.msra.mxu1 %v410_v37  ;;  %334 = vmatpush.xpose.msra.mxu0 %v1257_v6  ;;  %v446_v34 = vand.u32 4294901760, %v445_v31 }
  0x47   : > { %530 = vmatpush.xpose.msra.mxu3 %v1257_v6 }
  0x48   : > { %488 = vmatpush.xpose.msra.mxu2 %v1272_v23 }
  0x4a   : > { %417 = vmatpush.xpose.msra.mxu1 %v416_v51  ;;  %336 = vmatpush.xpose.msra.mxu0 %v1279_v30 }
  0x4b   : > { %532 = vmatpush.xpose.msra.mxu3 %v1279_v30 }
  0x4c   : > { %491 = vmatpush.xpose.msra.mxu2 %v1291_v41 }
  0x4e   : > { %423 = vmatpush.xpose.msra.mxu1 %v422_v58  ;;  %338 = vmatpush.xpose.msra.mxu0 %v1293_v44 }
  0x4f   : > { %534 = vmatpush.xpose.msra.mxu3 %v1293_v44 }
  0x50   : > { %494 = vmatpush.xpose.msra.mxu2 %v1305_v54 }
  0x52   : > { %429 = vmatpush.xpose.msra.mxu1 %v428_v4  ;;  %340 = vmatpush.xpose.msra.mxu0 %v1307_v55 }
  0x53   : > { %536 = vmatpush.xpose.msra.mxu3 %v1307_v55 }
  0x54   : > { %497 = vmatpush.xpose.msra.mxu2 %v1318_v63 }
  0x56   : > { %435 = vmatpush.xpose.msra.mxu1 %v434_v21  ;;  %342 = vmatpush.xpose.msra.mxu0 %v1320_v0 }
  0x57   : > { %538 = vmatpush.xpose.msra.mxu3 %v1320_v0 }
  0x58   : > { %500 = vmatpush.xpose.msra.mxu2 %v1330_v11 }
  0x5a   : > { %549 = vmatpush.xpose.msrb.mxu0 %v354_v18  ;;  %441 = vmatpush.xpose.msra.mxu1 %v440_v27 }
  0x5e   : > { %553 = vmatpush.xpose.msrb.mxu0 %v360_v19  ;;  %447 = vmatpush.xpose.msra.mxu1 %v446_v34  ;;  %v1031_v19 = vmov 0  }
  0x5f   : > { %954 = vset.pattern.permute.xlu0 %v1031_v19 }
  0x62   : > { %616 = vmatpush.xpose.msrb.mxu1 %v1131_v8  ;;  %557 = vmatpush.xpose.msrb.mxu0 %v366_v24  ;;  %v343_v8 = vand.u32 4294901760, %v261_v14  ;;  %v1032_v24 = vmov 1  }
  0x63   : > { %955 = vset.pattern.permute.xlu1 %v1032_v24 }
  0x64   : > { %449 = vmatmul.f32.vlgmr.msra.gmra.mxu1 %v343_v8 }
  0x66   : > { %618 = vmatpush.xpose.msrb.mxu1 %v1133_v9  ;;  %561 = vmatpush.xpose.msrb.mxu0 %v372_v32  ;;  %v344_v9 = vsub.f32 %v261_v14, %v343_v8  ;;  %v1035_v32 = vmov 2  }
  0x68   : > { %503 = vmatmul.f32.vlgmr.msra.gmra.mxu2 %v344_v9  ;;  %v345_v15 = vand.u32 4294901760, %v344_v9 }
  0x6a   : > { %620 = vmatpush.xpose.msrb.mxu1 %v1135_v10  ;;  %565 = vmatpush.xpose.msrb.mxu0 %v378_v39  ;;  %v346_v10 = vsub.f32 %v344_v9, %v345_v15  ;;  %v1038_v39 = vmov 6  }
  0x6b   : > { %542 = vmatmul.f32.vlgmr.msra.gmra.mxu3 %v345_v15 }
  0x6c   : > { %v347_v18 = vand.u32 4294901760, %v346_v10 }
  0x6e   : > { %622 = vmatpush.xpose.msrb.mxu1 %v1138_v12  ;;  %569 = vmatpush.xpose.msrb.mxu0 %v384_v46  ;;  %v252_v12 = vld [vmem:[%s1461_s2] sm:$0x7f] }
  0x6f   : > { %348 = vmatmul.f32.vlgmr.msra.gmra.mxu0 %v347_v18  ;;  %256 = vperm.xlu0 %954, %v252_v12  }
  0x72   : > { %624 = vmatpush.xpose.msrb.mxu1 %v1156_v20  ;;  %573 = vmatpush.xpose.msrb.mxu0 %v390_v49  ;;  %v253_v20 = vld [vmem:[%s1462_s3] sm:$0xff] }
  0x73   : > { %695 = vperm.xlu1 %955, %v253_v20   ;;  %724 = vperm.xlu2 %957, %v253_v20  }
  0x76   : > { %626 = vmatpush.xpose.msrb.mxu1 %v1173_v28  ;;  %577 = vmatpush.xpose.msrb.mxu0 %v396_v57  ;;  %v1034_v28 = vmov 5  }
  0x77   : > { %684 = vperm.xlu0 %954, %v253_v20  }
  0x7a   : > { %628 = vmatpush.xpose.msrb.mxu1 %v1187_v35  ;;  %581 = vmatpush.xpose.msrb.mxu0 %v402_v1  ;;  %v1037_v35 = vmov 7  }
  0x7b   : > { %956 = vset.pattern.permute.xlu1 %v1035_v32  ;;  %958 = vset.pattern.permute.xlu2 %v1036_v33 }
  0x7c   : > { %710 = vperm.xlu1 %956, %v253_v20   ;;  %741 = vperm.xlu2 %958, %v253_v20  }
  0x7e   : > { %630 = vmatpush.xpose.msrb.mxu1 %v1204_v43  ;;  %585 = vmatpush.xpose.msrb.mxu0 %v408_v16 }
  0x7f   : > { %959 = vset.pattern.permute.xlu0 %v1034_v28 }
  0x80   : > { %755 = vperm.xlu0 %959, %v253_v20  }
  0x82   : > { %632 = vmatpush.xpose.msrb.mxu1 %v1223_v53  ;;  %589 = vmatpush.xpose.msrb.mxu0 %v414_v29 }
  0x84   : > { %960 = vset.pattern.permute.xlu1 %v1038_v39  ;;  %961 = vset.pattern.permute.xlu2 %v1037_v35 }
  0x85   : > { %772 = vperm.xlu1 %960, %v253_v20   ;;  %786 = vperm.xlu2 %961, %v253_v20  }
  0x86   : > { %634 = vmatpush.xpose.msrb.mxu1 %v1237_v60  ;;  %593 = vmatpush.xpose.msrb.mxu0 %v420_v36 }
  0x88   : > { %962 = vset.pattern.permute.xlu0 %v1037_v35 }
  0x8a   : > { %636 = vmatpush.xpose.msrb.mxu1 %v1251_v3  ;;  %597 = vmatpush.xpose.msrb.mxu0 %v426_v52 }
  0x8e   : > { %638 = vmatpush.xpose.msrb.mxu1 %v1257_v6  ;;  %601 = vmatpush.xpose.msrb.mxu0 %v432_v62 }
  0x92   : > { %640 = vmatpush.xpose.msrb.mxu1 %v1279_v30  ;;  %605 = vmatpush.xpose.msrb.mxu0 %v438_v7 }
  0x96   : > { %642 = vmatpush.xpose.msrb.mxu1 %v1293_v44  ;;  %609 = vmatpush.xpose.msrb.mxu0 %v444_v26 }
  0x99   : > { %611 = vmatmul.f32.vlgmr.msrb.gmra.mxu0 %v343_v8 }
  0x9a   : > { %644 = vmatpush.xpose.msrb.mxu1 %v1307_v55 }
  0x9e   : > { %646 = vmatpush.xpose.msrb.mxu1 %v1320_v0 }
  0xa1   : > { %648 = vmatmul.f32.vlgmr.msrb.gmra.mxu1 %v343_v8 }
  0xcd   : > { %v725_v52 = vpop.permute.xlu2 %724 }
  0xd6   : > { %v742_v28 = vpop.permute.xlu2 %741 }
  0xe1   : > { %v257_v42 = vpop.permute.xlu0 %256  ;;  %v450_v46 = vpop.f32.mrf.mxu1 }
  0xe5   : > { %v696_v47 = vpop.permute.xlu1 %695 }
  0xe9   : > { %v685_v8 = vpop.permute.xlu0 %684 }
  0xeb   : > { %v504_v50 = vpop.f32.mrf.mxu2 }
  0xec   : > { %v349_v40 = vpop.f32.mrf.mxu0 }
  0xed   : > { %v350_v43 = vadd.f32 %v349_v40, %v257_v42 }
  0xee   : > { %v543_v57 = vpop.f32.mrf.mxu3  ;;  %v711_v9 = vpop.permute.xlu1 %710 }
  0xef   : > { %v451_v49 = vadd.f32 %v450_v46, %v350_v43 }
  0xf1   : > { %v505_v53 = vadd.f32 %v504_v50, %v451_v49 }
  0xf3   : > { %v544_v59 = vadd.f32 %v543_v57, %v505_v53 }
 0x116   : > { %v612_v60 = vpop.f32.mrf.mxu0 }
 0x117   : > { %v613_v1 = vadd.f32 %v612_v60, %v544_v59 }
 0x11e   : > { %v649_v2 = vpop.f32.mrf.mxu1 }
 0x11f   : > { %v650_v3 = vadd.f32 %v649_v2, %v613_v1 }
 0x121   : > { %v904_v6 = vmul.f32 -1.442695, %v650_v3 }
 0x123   : > { %963 = vpow2.f32 %v904_v6 }
 0x129   : > { %v964_v16 = vpop.eup %963 }
 0x12a   : > { %v655_v17 = vadd.f32 1.0, %v964_v16 }
 0x12c   : > { %965 = vrcp.f32 %v655_v17  ;;  %v667_v36 = vand.u32 2147483648, %v655_v17  ;;  %v665_v38 = vand.u32 2147483647, %v655_v17  ;;  %vm661_vm2 = vweird.f32 %v655_v17 }
 0x12e   : > { %v668_v44 = vor.u32 1.1754944e-38, %v667_v36  ;;  %vm666_vm4 = vcmp.eq.f32.partialorder %v665_v38, 8.507059e+37 }
 0x132   : > { %v966_v23 = vpop.eup %965 }
 0x133   : > { %v657_v29 = vmul.f32 %v966_v23, %v655_v17  ;;  %vm662_vm1 = vweird.f32 %v966_v23 }
 0x134   : > { %vm663_vm3 = vmor %vm661_vm2, %vm662_vm1 }
 0x135   : > { %v658_v30 = vsub.f32 1.0, %v657_v29 }
 0x137   : > { %v659_v37 = vmul.f32 %v966_v23, %v658_v30 }
 0x139   : > { %v660_v41 = vadd.f32 %v966_v23, %v659_v37 }
 0x13b   : > { %v664_v45 = vsel %vm663_vm3, %v966_v23, %v660_v41  ;;  %v756_v23 = vpop.permute.xlu0 %755  ;;  %v773_v41 = vpop.permute.xlu1 %772 }
 0x13c   : > { %v669_v48 = vsel %vm666_vm4, %v668_v44, %v664_v45 }
 0x13d   : > { %vm671_vm5 = vcmp.ge.f32.partialorder %v669_v48, 0.5  ;;  %v673_v51 = vsub.f32 1.0, %v669_v48 }
 0x13e   : > { %v672_v54 = vsel %vm671_vm5, %v669_v48, 0.0 }
 0x13f   : > { %v674_v55 = vsel %vm671_vm5, 0.0, %v673_v51  ;;  %v703_v56 = vrot.slane %v672_v54, 1  ;;  %v720_v58 = vrot.slane %v672_v54, 4  ;;  %v691_v0 = vrot.slane %v672_v54, 3 }
 0x140   : > { %v676_v61 = vrot.slane %v674_v55, 1  ;;  %v734_v62 = vrot.slane %v674_v55, 2  ;;  %v706_v4 = vrot.slane %v674_v55, 4  ;;  %v765_v5 = vrot.slane %v672_v54, 2 }
 0x141   : > { %v705_v63 = vmul.f32 %v703_v56, %v674_v55  ;;  %v679_v11 = vrot.slane %v674_v55, 3  ;;  %v737_v22 = vrot.slane %v674_v55, 5  ;;  %v768_v14 = vrot.slane %v674_v55, 6 }
 0x142   : > { %v678_v7 = vmul.f32 %v676_v61, %v674_v55  ;;  %v736_v21 = vmul.f32 %v734_v62, %v672_v54  ;;  %v767_v10 = vmul.f32 %v765_v5, %v672_v54  ;;  %v751_v18 = vrot.slane %v672_v54, 5 }
 0x143   : > { %v722_v26 = vmul.f32 %v720_v58, %v705_v63  ;;  %v708_v27 = vmul.f32 %v706_v4, %v705_v63  ;;  %v782_v32 = vrot.slane %v672_v54, 6 }
 0x144   : > { %v681_v31 = vmul.f32 %v679_v11, %v678_v7  ;;  %v693_v34 = vmul.f32 %v691_v0, %v678_v7  ;;  %v739_v13 = vmul.f32 %v737_v22, %v736_v21  ;;  %v753_v33 = vmul.f32 %v751_v18, %v736_v21 }
 0x145   : > { %vm730_vm6 = vcmp.gt.f32.partialorder %v722_v26, 0.0  ;;  %v713_v15 = vperm.slane %v708_v27, 0  ;;  %vm716_vm8 = vcmp.gt.f32.partialorder %v708_v27, 0.0  ;;  %v727_v24 = vperm.slane %v722_v26, 0 }
 0x146   : > { %v687_v12 = vperm.slane %v681_v31, 0  ;;  %v698_v20 = vperm.slane %v693_v34, 0  ;;  %vm701_vm7 = vcmp.gt.f32.partialorder %v693_v34, 0.0  ;;  %v731_v25 = vsel %vm730_vm6, 1, %v1031_v19 }
 0x147   : > { %v702_v40 = vsel %vm701_vm7, 1, %v1031_v19  ;;  %vm747_vm9 = vcmp.gt.f32.partialorder %v739_v13, 0.0  ;;  %v744_v42 = vperm.slane %v739_v13, 0  ;;  %v714_v46 = vmul.f32 %v713_v15, %v711_v9 }
 0x148   : > { %v688_v35 = vmul.f32 %v687_v12, %v685_v8  ;;  %v699_v39 = vmul.f32 %v698_v20, %v696_v47  ;;  %v748_v43 = vsel %vm747_vm9, 1, %v1031_v19  ;;  %v717_v49 = vsel %vm716_vm8, 1, %v1031_v19 }
 0x149   : > { %v718_v53 = vmul.u32 2, %v717_v49  ;;  %v784_v57 = vmul.f32 %v782_v32, %v767_v10  ;;  %v770_v59 = vmul.f32 %v768_v14, %v767_v10  ;;  %v728_v60 = vmul.f32 %v727_v24, %v725_v52  ;;  %v787_v52 = vpop.permute.xlu2 %786 }
 0x14a   : > { %v700_v50 = vadd.f32 %v699_v39, %v688_v35  ;;  %vm761_vm10 = vcmp.gt.f32.partialorder %v753_v33, 0.0  ;;  %v732_v1 = vmul.u32 3, %v731_v25  ;;  %v758_v6 = vperm.slane %v753_v33, 0 }
 0x14b   : > { %v719_v3 = vadd.s32 %v718_v53, %v702_v40  ;;  %v745_v16 = vmul.f32 %v744_v42, %v742_v28  ;;  %v749_v17 = vmul.u32 4, %v748_v43  ;;  %vm778_vm11 = vcmp.gt.f32.partialorder %v770_v59, 0.0 }
 0x14c   : > { %v715_v2 = vadd.f32 %v714_v46, %v700_v50  ;;  %v762_v29 = vsel %vm761_vm10, 1, %v1031_v19  ;;  %vm792_vm12 = vcmp.gt.f32.partialorder %v784_v57, 0.0  ;;  %v775_v37 = vperm.slane %v770_v59, 0 }
 0x14d   : > { %v733_v36 = vadd.s32 %v732_v1, %v719_v3  ;;  %v789_v38 = vperm.slane %v784_v57, 0  ;;  %v779_v44 = vsel %vm778_vm11, 1, %v1031_v19  ;;  %v759_v47 = vmul.f32 %v758_v6, %v756_v23 }
 0x14e   : > { %v729_v30 = vadd.f32 %v728_v60, %v715_v2  ;;  %v763_v48 = vmul.u32 5, %v762_v29  ;;  %v793_v54 = vsel %vm792_vm12, 1, %v1031_v19  ;;  %v776_v55 = vmul.f32 %v775_v37, %v773_v41 }
 0x14f   : > { %v750_v51 = vadd.s32 %v749_v17, %v733_v36  ;;  %v780_v56 = vmul.u32 6, %v779_v44  ;;  %v790_v62 = vmul.f32 %v789_v38, %v787_v52  ;;  %v794_v4 = vmul.u32 7, %v793_v54 }
 0x150   : > { %v746_v45 = vadd.f32 %v745_v16, %v729_v30 }
 0x151   : > { %v764_v61 = vadd.s32 %v763_v48, %v750_v51 }
 0x152   : > { %v760_v58 = vadd.f32 %v759_v47, %v746_v45 }
 0x153   : > { %v781_v0 = vadd.s32 %v780_v56, %v764_v61 }
 0x154   : > { %v777_v63 = vadd.f32 %v776_v55, %v760_v58 }
 0x155   : > { %v795_v5 = vadd.s32 %v794_v4, %v781_v0 }
 0x156   : > { %v791_v19 = vadd.f32 %v790_v62, %v777_v63 }
 0x157   : > { %797 = vst [vmem:[%s224_s6] sm:$0x1] %v795_v5 }
 0x158   : > { %796 = vst [vmem:[%s234_s11] sm:$0xff] %v791_v19 }
 0x159   : > { %994 = shalt.err (!%p991_p4)
}
 0x15a   : > { %907 = dma.vmem_to_hbm [thread:$0]  (%p1107_p5), %s817_s7, 16, %s819_s8, %s803_s22  }
 0x15b PF: > { %p913_p7 = scmp.ge.s32.totalorder %s1029_s21, 2  ;;  %s837_s17 = sand.u32 1, %s1017_s18  }
 0x15c   : > { %s838_s26 = scalar_lea.sflag [#allocation3], %s837_s17 }
 0x15d   : > { %p910_p8 = pnand %p913_p7, %p1111_p6 }
 0x15f   : > { %p911_p9 = pneg %p910_p8 }
 0x161   : > { %1012 = dma.done.wait (%p911_p9), %s838_s26, 16  }
 0x162   : > { %1014 = vsyncadd (%p911_p9), %s838_s26, 4294967280  ;;  %p16_p10 = scmp.ge.s32.totalorder %s1094_s24, 4   ;;  %s1467_s18 = smov %s1021_s19 }
 0x163   : > { %s1468_s19 = smov %s1025_s20  ;;  %s1469_s20 = smov %s1105_s27 }
 0x164   : > { %s1470_s21 = smov %s1094_s24  ;;  %18 = sbr.rel (!%p16_p10) target bundleno = 3 (0x3), region = 83 }
 0x169   :  { %843 = vsyncpa [#allocation3], 1 }
 0x16a   :  { %845 = vsyncpa [#allocation3 + $0x1], 1 }

</bundles_post_ra>
